<compile_context>
chip_gen: v6e
topology: v6e:2x2x1
jax: 0.10.0
libtpu: 0.0.40
codegen_flags: <defaults>
</compile_context>

<pallas_src>
import math

import jax
import jax.numpy as jnp
from jax.experimental import pallas as pl
from jax.experimental.pallas import tpu as pltpu

_LANE = 128      # vreg lane width
_SUBLANE = 8     # vreg sublane count


def _round_up(n, m):
    return ((n + m - 1) // m) * m


# ----------------------------- kernel body ---------------------------------

def _mlp_kernel(x_ref, w1_ref, wr_ref, b_ref, o_ref):
    """Fused MLP: x @ W1 + b1 -> ReLU -> ... -> @ Wk + bk.

    x_ref : (tb, state_dim) f32   (true contraction dim, no lane padding)
    w1_ref: (state_dim, H_pad) f32
    wr_ref: (L-1, H_pad, H_pad) f32  (hidden layers 2..L-1 and the head,
                                      zero-padded to a common lane-dense shape)
    b_ref : (L, H_pad) f32           (all biases, zero-padded)
    o_ref : (tb, H_pad)              (lane-dense output slab; wrapper slices)
    """
    n_rest = wr_ref.shape[0]

    h = jnp.dot(x_ref[...], w1_ref[...], preferred_element_type=jnp.float32)
    h = jnp.maximum(h + b_ref[0:1, :], 0.0)

    # Hidden layers 2..L-1 (static Python loop; shapes known at trace time).
    for i in range(n_rest - 1):
        h = jnp.dot(h, wr_ref[i], preferred_element_type=jnp.float32)
        h = jnp.maximum(h + b_ref[i + 1:i + 2, :], 0.0)

    # Head (no activation).
    out = jnp.dot(h, wr_ref[n_rest - 1], preferred_element_type=jnp.float32)
    o_ref[...] = (out + b_ref[n_rest:n_rest + 1, :]).astype(o_ref.dtype)


# ----------------------------- host wrappers --------------------------------

def pack_params(params):
    """Pack (W, b) pairs into 3 lane-dense f32 operands.

    Input : layer k has W_k (in_k, out_k) f32 (y = x @ W + b layout),
            b_k (1, out_k) f32.  Layer 1 is the first hidden layer, the last
            layer is the action head.
    Output:
      w1     (in_1, H_pad)        first layer, true K dim, padded out lanes
      w_rest (L-1, H_pad, H_pad)  remaining layers, zero-padded + stacked
      b_all  (L, H_pad)           all biases, zero-padded
    """
    ws = [jnp.asarray(w, jnp.float32) for w, _ in params]
    bs = [jnp.asarray(b, jnp.float32).reshape(1, -1) for _, b in params]
    assert len(ws) >= 2, "need at least one hidden layer plus the head"

    in_dims = [w.shape[0] for w in ws]
    out_dims = [w.shape[1] for w in ws]
    # Common lane-dense width for all hidden activations and the output slab.
    h_pad = _round_up(max(out_dims + in_dims[1:]), _LANE)

    w1 = jnp.zeros((in_dims[0], h_pad), jnp.float32)
    w1 = w1.at[:, :out_dims[0]].set(ws[0])

    rest = []
    for w in ws[1:]:
        wp = jnp.zeros((h_pad, h_pad), jnp.float32)
        wp = wp.at[:w.shape[0], :w.shape[1]].set(w)
        rest.append(wp)
    w_rest = jnp.stack(rest, axis=0)

    b_all = jnp.zeros((len(bs), h_pad), jnp.float32)
    for i, b in enumerate(bs):
        b_all = b_all.at[i, :b.shape[1]].set(b[0])

    return w1, w_rest, b_all


def mlp_forward(x, packed_params, action_dim):
    """Fused MLP forward. x: (batch, state_dim) f32 -> (batch, action_dim) f32."""
    w1, w_rest, b_all = packed_params
    batch, state_dim = x.shape
    assert state_dim == w1.shape[0]
    h_pad = w1.shape[1]

    # Batch tiling: sublane-aligned; up to 512 rows/step for large batches,
    # capped so the parallel grid keeps >= 2 steps (v7x megacore sharding).
    if batch <= _LANE:
        tb = _round_up(batch, _SUBLANE)
    else:
        tb = _round_up(min(batch, 512), _SUBLANE)
        half = _round_up(pl.cdiv(batch, 2), _SUBLANE)
        tb = max(_SUBLANE, min(tb, half))
    b_pad = _round_up(batch, tb)

    # Only the batch dim is padded (state dim stays at its true width).
    if b_pad != batch:
        x_p = jnp.zeros((b_pad, state_dim), x.dtype).at[:batch].set(x)
    else:
        x_p = x

    def rep(a):
        return pl.BlockSpec(a.shape, lambda i, _nd=a.ndim: (0,) * _nd)

    out_p = pl.pallas_call(
        _mlp_kernel,
        out_shape=jax.ShapeDtypeStruct((b_pad, h_pad), x.dtype),
        grid=(b_pad // tb,),
        in_specs=[
            pl.BlockSpec((tb, state_dim), lambda i: (i, 0)),  # x: tiled batch
            rep(w1), rep(w_rest), rep(b_all),                 # resident weights
        ],
        # Lane-dense (tb, 128) unmasked store; wrapper slices to action_dim.
        # TODO(synk): at very large batch a true-width (tb, action_dim) store
        # may win on HBM-write-bound chips (v5e); benchmark if that regime hits.
        out_specs=pl.BlockSpec((tb, h_pad), lambda i: (i, 0)),
        compiler_params=pltpu.CompilerParams(
            dimension_semantics=("parallel",)),
    )(x_p, w1, w_rest, b_all)

    return out_p[:batch, :action_dim]


# --------------------------- init + reference -------------------------------

def init_params(key, state_dim, action_dim, hidden_size):
    """Mirrors the PyTorch module init (xavier_uniform hidden weights, default
    nn.Linear for the head).  Weights stored as (in, out), biases as (1, out)."""
    params = []
    last_dim = state_dim
    dims = list(hidden_size) + [action_dim]
    for i, nh in enumerate(dims):
        key, kw, kb = jax.random.split(key, 3)
        if i < len(hidden_size):
            a = math.sqrt(6.0 / (last_dim + nh))        # xavier_uniform
        else:
            a = 1.0 / math.sqrt(last_dim)               # default nn.Linear-ish
        w = jax.random.uniform(kw, (last_dim, nh), jnp.float32, minval=-a, maxval=a)
        bb = 1.0 / math.sqrt(last_dim)
        b = jax.random.uniform(kb, (1, nh), jnp.float32, minval=-bb, maxval=bb)
        params.append((w, b))
        last_dim = nh
    return params


def reference_forward_f32(x, params):
    h = x
    for i, (w, b) in enumerate(params):
        h = h @ w + b
        if i < len(params) - 1:
            h = jnp.maximum(h, 0.0)
    return h


# --------------------------------- main --------------------------------------

if __name__ == "__main__":
    key = jax.random.PRNGKey(0)

    batch = 8
    state_dim = 32
    hidden_size = (64, 64)
    action_dim = 4

    kp, kx = jax.random.split(key)
    params = init_params(kp, state_dim, action_dim, hidden_size)
    x = jax.random.normal(kx, (batch, state_dim), jnp.float32)

    packed = pack_params(params)          # one-time lane-dense f32 packing
    out = mlp_forward(x, packed, action_dim)
    out = jax.block_until_ready(out)

    assert out.shape == (batch, action_dim)

    ref_f32 = reference_forward_f32(x, params)
    assert jnp.allclose(out, ref_f32, atol=2e-2, rtol=2e-2), \
        "mismatch vs f32 reference"

    print("KERNEL_OK")
</pallas_src>

<mosaic_0001>
module attributes {stable_mosaic.version = 11 : i64} {
  func.func @_mlp_kernel(%arg0: i32, %arg1: memref<8x32xf32, #tpu.memory_space<vmem>>, %arg2: memref<32x128xf32, #tpu.memory_space<vmem>>, %arg3: memref<2x128x128xf32, #tpu.memory_space<vmem>>, %arg4: memref<3x128xf32, #tpu.memory_space<vmem>>, %arg5: memref<8x128xf32, #tpu.memory_space<vmem>>) attributes {dimension_semantics = [#tpu.dimension_semantics<parallel>], iteration_bounds = array<i64: 1>, scalar_prefetch = 0 : i64, scratch_operands = 0 : i64, tpu.core_type = #tpu.core_type<tc>, window_params = [{transform_indices = @transform_0, window_bounds = array<i64: 8, 32>}, {pipeline_mode = #tpu.pipeline_mode<synchronous>, transform_indices = @transform_1, window_bounds = array<i64: 32, 128>}, {pipeline_mode = #tpu.pipeline_mode<synchronous>, transform_indices = @transform_2, window_bounds = array<i64: 2, 128, 128>}, {pipeline_mode = #tpu.pipeline_mode<synchronous>, transform_indices = @transform_3, window_bounds = array<i64: 3, 128>}, {transform_indices = @transform_4, window_bounds = array<i64: 8, 128>}]} {
    %c0 = arith.constant 0 : index
    %c0_0 = arith.constant 0 : index
    %0 = vector.load %arg1[%c0, %c0_0] : memref<8x32xf32, #tpu.memory_space<vmem>>, vector<8x32xf32>
    %c0_1 = arith.constant 0 : index
    %c0_2 = arith.constant 0 : index
    %1 = vector.load %arg2[%c0_1, %c0_2] : memref<32x128xf32, #tpu.memory_space<vmem>>, vector<32x128xf32>
    %cst = arith.constant dense<0.000000e+00> : vector<8x128xf32>
    %2 = tpu.matmul %0, %1, %cst {dimension_numbers = #tpu.dot_dimension_numbers<[1], [0], [0], [1], [0, 0, 1, 1], [], []>} : vector<8x32xf32>, vector<32x128xf32>, vector<8x128xf32> -> vector<8x128xf32>
    %c0_3 = arith.constant 0 : index
    %c0_4 = arith.constant 0 : index
    %3 = vector.load %arg4[%c0_3, %c0_4] : memref<3x128xf32, #tpu.memory_space<vmem>>, vector<1x128xf32>
    %4 = vector.broadcast %3 : vector<1x128xf32> to vector<8x128xf32>
    %5 = arith.addf %2, %4 : vector<8x128xf32>
    %cst_5 = arith.constant 0.000000e+00 : f32
    %6 = vector.broadcast %cst_5 : f32 to vector<8x128xf32>
    %7 = arith.maximumf %5, %6 : vector<8x128xf32>
    %c0_6 = arith.constant 0 : index
    %c0_7 = arith.constant 0 : index
    %c0_8 = arith.constant 0 : index
    %8 = vector.load %arg3[%c0_6, %c0_7, %c0_8] : memref<2x128x128xf32, #tpu.memory_space<vmem>>, vector<1x128x128xf32>
    %9 = vector.shape_cast %8 : vector<1x128x128xf32> to vector<128x128xf32>
    %cst_9 = arith.constant dense<0.000000e+00> : vector<8x128xf32>
    %10 = tpu.matmul %7, %9, %cst_9 {dimension_numbers = #tpu.dot_dimension_numbers<[1], [0], [0], [1], [0, 0, 1, 1], [], []>} : vector<8x128xf32>, vector<128x128xf32>, vector<8x128xf32> -> vector<8x128xf32>
    %c1 = arith.constant 1 : index
    %c0_10 = arith.constant 0 : index
    %11 = vector.load %arg4[%c1, %c0_10] : memref<3x128xf32, #tpu.memory_space<vmem>>, vector<1x128xf32>
    %12 = vector.broadcast %11 : vector<1x128xf32> to vector<8x128xf32>
    %13 = arith.addf %10, %12 : vector<8x128xf32>
    %cst_11 = arith.constant 0.000000e+00 : f32
    %14 = vector.broadcast %cst_11 : f32 to vector<8x128xf32>
    %15 = arith.maximumf %13, %14 : vector<8x128xf32>
    %c1_12 = arith.constant 1 : index
    %c0_13 = arith.constant 0 : index
    %c0_14 = arith.constant 0 : index
    %16 = vector.load %arg3[%c1_12, %c0_13, %c0_14] : memref<2x128x128xf32, #tpu.memory_space<vmem>>, vector<1x128x128xf32>
    %17 = vector.shape_cast %16 : vector<1x128x128xf32> to vector<128x128xf32>
    %cst_15 = arith.constant dense<0.000000e+00> : vector<8x128xf32>
    %18 = tpu.matmul %15, %17, %cst_15 {dimension_numbers = #tpu.dot_dimension_numbers<[1], [0], [0], [1], [0, 0, 1, 1], [], []>} : vector<8x128xf32>, vector<128x128xf32>, vector<8x128xf32> -> vector<8x128xf32>
    %c2 = arith.constant 2 : index
    %c0_16 = arith.constant 0 : index
    %19 = vector.load %arg4[%c2, %c0_16] : memref<3x128xf32, #tpu.memory_space<vmem>>, vector<1x128xf32>
    %20 = vector.broadcast %19 : vector<1x128xf32> to vector<8x128xf32>
    %21 = arith.addf %18, %20 : vector<8x128xf32>
    %c0_17 = arith.constant 0 : index
    %c0_18 = arith.constant 0 : index
    %22 = vector.load %arg5[%c0_17, %c0_18] : memref<8x128xf32, #tpu.memory_space<vmem>>, vector<8x128xf32>
    tpu.vector_store %arg5[%c0_17, %c0_18], %21 {strides = array<i32>} : memref<8x128xf32, #tpu.memory_space<vmem>>, vector<8x128xf32>,
    return
  }
  func.func @transform_0(%arg0: i32) -> (i32, i32) {
    %c0_i32 = arith.constant 0 : i32
    %c0_i32_0 = arith.constant 0 : i32
    return %arg0, %c0_i32 : i32, i32
  }
  func.func @transform_1(%arg0: i32) -> (i32, i32) {
    %c0_i32 = arith.constant 0 : i32
    %c0_i32_0 = arith.constant 0 : i32
    %c0_i32_1 = arith.constant 0 : i32
    return %c0_i32, %c0_i32_0 : i32, i32
  }
  func.func @transform_2(%arg0: i32) -> (i32, i32, i32) {
    %c0_i32 = arith.constant 0 : i32
    %c0_i32_0 = arith.constant 0 : i32
    %c0_i32_1 = arith.constant 0 : i32
    %c0_i32_2 = arith.constant 0 : i32
    return %c0_i32, %c0_i32_0, %c0_i32_1 : i32, i32, i32
  }
  func.func @transform_3(%arg0: i32) -> (i32, i32) {
    %c0_i32 = arith.constant 0 : i32
    %c0_i32_0 = arith.constant 0 : i32
    %c0_i32_1 = arith.constant 0 : i32
    return %c0_i32, %c0_i32_0 : i32, i32
  }
  func.func @transform_4(%arg0: i32) -> (i32, i32) {
    %c0_i32 = arith.constant 0 : i32
    %c0_i32_0 = arith.constant 0 : i32
    return %arg0, %c0_i32 : i32, i32
  }
}

</mosaic_0001>

<bundles_post_ra>
// kernel: tpu_custom_call.1
= control target key start
LH: loop header
LB: loop body
LE: loop exit
PB: predicated region body
PF: predicated region fallthrough
CT: control target
= control target key end

     0   :  { %9 = vsyncpa [#allocation3], 0  ;;  %s657_s0 = inlined_call_operand.hbm [shape: f32[8,32], index: 0, kind: input, shape index: {}]   ;;  %s658_s1 = inlined_call_operand.hbm [shape: f32[32,128], index: 1, kind: input, shape index: {}]   ;;  %s659_s2 = inlined_call_operand.hbm [shape: f32[2,128,128], index: 2, kind: input, shape index: {}]   ;;  %s660_s3 = inlined_call_operand.vmem [shape: f32[3,128], index: 3, kind: input, shape index: {}]   ;;  %s661_s4 = inlined_call_operand.hbm [shape: f32[8,128], index: 4, kind: output, shape index: {}]  }
   0x1   :  { %10 = vsyncpa [#allocation6], 0 }
   0x2   :  { %11 = vsyncpa [#allocation4], 0  ;;  %s561_s15 = smov [#allocation5]  }
   0x3   :  { %s27_s16 = sshll.u32 %s561_s15, 4  ;;  %s28_s16 = int_to_ptr.vmem [resolvable:$true] %s27_s16 }
   0x4   :  { %s483_s17 = scalar_lea.vmem %s28_s16, 512  ;;  %p488_p1 = scmp.lt.s32.totalorder %s28_s16, %s28_s16 }
   0x5   :  { %p484_p0 = scmp.ne.s32.totalorder %s28_s16, %s483_s17  ;;  %p489_p2 = scmp.lt.s32.totalorder %s483_s17, %s483_s17 }
   0x7   :  { %p490_p3 = por %p489_p2, %p488_p1 }
   0x9   :  { %p491_p4 = pnand %p490_p3, %p484_p0 }
   0xb   :  { %494 = shalt.err (!%p491_p4)
}
   0xc   :  { %s562_s18 = smov 128   ;;  %s563_s19 = smov 8  }
   0xd   :  { %33 = dma.hbm_to_vmem [thread:$0]  %s658_s1, 512, %s28_s16, [#allocation6], %s562_s18, %s562_s18, %s563_s19  }
   0xe   :  { %s564_s22 = smov [#allocation2]   ;;  %s565_s24 = smov [#allocation7]  }
   0xf   :  { %s18_s23 = sshll.u32 %s564_s22, 4  ;;  %s39_s25 = sshll.u32 %s565_s24, 4  ;;  %s19_s23 = int_to_ptr.vmem [resolvable:$true] %s18_s23  ;;  %s40_s25 = int_to_ptr.vmem [resolvable:$true] %s39_s25 }
  0x10   :  { %s503_s26 = scalar_lea.vmem %s19_s23, 128  ;;  %p508_p6 = scmp.lt.s32.totalorder %s19_s23, %s19_s23 }
  0x11   :  { %p504_p5 = scmp.ne.s32.totalorder %s19_s23, %s503_s26  ;;  %p509_p7 = scmp.lt.s32.totalorder %s503_s26, %s503_s26 }
  0x13   :  { %p510_p8 = por %p509_p7, %p508_p6 }
  0x15   :  { %p511_p9 = pnand %p510_p8, %p504_p5 }
  0x17   :  { %514 = shalt.err (!%p511_p9)
}
  0x18   :  { %21 = dma.hbm_to_vmem [thread:$0]  %s657_s0, 128, %s19_s23, [#allocation3]  }
  0x19   :  { %s523_s29 = scalar_lea.vmem %s40_s25, 4096  ;;  %p528_p11 = scmp.lt.s32.totalorder %s40_s25, %s40_s25 }
  0x1a   :  { %p524_p10 = scmp.ne.s32.totalorder %s40_s25, %s523_s29  ;;  %p529_p12 = scmp.lt.s32.totalorder %s523_s29, %s523_s29 }
  0x1c   :  { %p530_p13 = por %p529_p12, %p528_p11 }
  0x1e   :  { %p531_p0 = pnand %p530_p13, %p524_p10 }
  0x20   :  { %534 = shalt.err (!%p531_p0)
}
  0x21   :  { %45 = dma.hbm_to_vmem [thread:$0]  %s659_s2, 4096, %s40_s25, [#allocation6], %s562_s18, %s562_s18, %s563_s19  }
  0x22   :  { %555 = dma.done.wait [#allocation3], 128  }
  0x23   :  { %556 = vsyncadd [#allocation3], 4294967168 }
  0x24   :  { %557 = dma.done.wait [#allocation6], 4608  }
  0x25   :  { %558 = vsyncadd [#allocation6], 4294962688  ;;  %v566_v0 = vmov 0.0   ;;  %vm567_vm0 = vmmov 0   ;;  %v61_v1 = vld [vmem:[#allocation5 + $0x18] sm:$0xff]  ;;  %v60_v2 = vld [vmem:[#allocation5 + $0x10] sm:$0xff] }
  0x26   :  { %386 = vmatprep.subr.mxu0 %v566_v0  ;;  %394 = vmatprep.mubr.msk.f32.mxu0 %vm567_vm0, %v566_v0  ;;  %v157_v3 = vld [vmem:[#allocation7 + $0x78] sm:$0xff]  ;;  %v59_v4 = vld [vmem:[#allocation5 + $0x8] sm:$0xff]  ;;  %v156_v5 = vld [vmem:[#allocation7 + $0x70] sm:$0xff]  ;;  %vm67_vm1 = vcmask 261120   ;;  %s568_s9 = smov [#allocation8]  }
  0x27   :  { %397 = vmatprep.subr.mxu1 %v566_v0  ;;  %429 = vmatprep.mubr.msk.f32.mxu1 %vm567_vm0, %v566_v0  ;;  %v155_v6 = vld [vmem:[#allocation7 + $0x68] sm:$0xff]  ;;  %v58_v7 = vld [vmem:[#allocation5] sm:$0xff]  ;;  %v57_v8 = vld [vmem:[#allocation2] sm:$0xff]  ;;  %s333_s10 = sshll.u32 %s568_s9, 4  ;;  %s334_s10 = int_to_ptr.vmem [resolvable:$true] %s333_s10 }
  0x28   :  { %387 = vmatpush3.msra.mxu0 %v61_v1  ;;  %398 = vmatpush3.msra.mxu1 %v157_v3  ;;  %v154_v9 = vld [vmem:[#allocation7 + $0x60] sm:$0xff]  ;;  %v153_v10 = vld [vmem:[#allocation7 + $0x58] sm:$0xff]  ;;  %v152_v11 = vld [vmem:[#allocation7 + $0x50] sm:$0xff]  ;;  %s535_s11 = scalar_lea.vmem %s334_s10, 128  ;;  %p540_p2 = scmp.lt.s32.totalorder %s334_s10, %s334_s10 }
  0x29   :  { %388 = vmatprep.subr.mxu0 %v566_v0  ;;  %399 = vmatprep.subr.mxu1 %v566_v0  ;;  %v151_v12 = vld [vmem:[#allocation7 + $0x48] sm:$0xff]  ;;  %v150_v13 = vld [vmem:[#allocation7 + $0x40] sm:$0xff]  ;;  %v149_v14 = vld [vmem:[#allocation7 + $0x38] sm:$0xff]  ;;  %p536_p1 = scmp.ne.s32.totalorder %s334_s10, %s535_s11  ;;  %p541_p3 = scmp.lt.s32.totalorder %s535_s11, %s535_s11 }
  0x2a   :  { %389 = vmatpush3.msra.mxu0 %v60_v2  ;;  %400 = vmatpush3.msra.mxu1 %v156_v5  ;;  %v148_v15 = vld [vmem:[#allocation7 + $0x30] sm:$0xff]  ;;  %v147_v16 = vld [vmem:[#allocation7 + $0x28] sm:$0xff]  ;;  %v146_v17 = vld [vmem:[#allocation7 + $0x20] sm:$0xff] }
  0x2b   :  { %390 = vmatprep.subr.mxu0 %v566_v0  ;;  %401 = vmatprep.subr.mxu1 %v566_v0  ;;  %v145_v18 = vld [vmem:[#allocation7 + $0x18] sm:$0xff]  ;;  %v144_v19 = vld [vmem:[#allocation7 + $0x10] sm:$0xff]  ;;  %v143_v20 = vld [vmem:[#allocation7 + $0x8] sm:$0xff]  ;;  %p542_p4 = por %p541_p3, %p540_p2 }
  0x2c   :  { %391 = vmatpush3.msra.mxu0 %v59_v4  ;;  %402 = vmatpush3.msra.mxu1 %v155_v6  ;;  %v142_v21 = vld [vmem:[#allocation7] sm:$0xff]  ;;  %v250_v22 = vld [vmem:[#allocation7 + $0xf8] sm:$0xff]  ;;  %v249_v23 = vld [vmem:[#allocation7 + $0xf0] sm:$0xff] }
  0x2d   :  { %392 = vmatprep.subr.mxu0 %v566_v0  ;;  %403 = vmatprep.subr.mxu1 %v566_v0  ;;  %v248_v24 = vld [vmem:[#allocation7 + $0xe8] sm:$0xff]  ;;  %v247_v25 = vld [vmem:[#allocation7 + $0xe0] sm:$0xff]  ;;  %v246_v26 = vld [vmem:[#allocation7 + $0xd8] sm:$0xff]  ;;  %p543_p5 = pnand %p542_p4, %p536_p1 }
  0x2e   :  { %393 = vmatpush3.msra.mxu0 %v58_v7  ;;  %404 = vmatpush3.msra.mxu1 %v154_v9  ;;  %v245_v27 = vld [vmem:[#allocation7 + $0xd0] sm:$0xff]  ;;  %v244_v28 = vld [vmem:[#allocation7 + $0xc8] sm:$0xff]  ;;  %v243_v29 = vld [vmem:[#allocation7 + $0xc0] sm:$0xff] }
  0x2f   :  { %395 = vmatmul.mubr.msk.f32.vlgmr.msra.gmra.mxu0 %vm67_vm1, %v57_v8  ;;  %405 = vmatprep.subr.mxu1 %v566_v0  ;;  %v242_v30 = vld [vmem:[#allocation7 + $0xb8] sm:$0xff]  ;;  %v241_v31 = vld [vmem:[#allocation7 + $0xb0] sm:$0xff]  ;;  %v240_v32 = vld [vmem:[#allocation7 + $0xa8] sm:$0xff] }
  0x30   :  { %432 = vmatprep.subr.mxu0 %v566_v0  ;;  %406 = vmatpush3.msra.mxu1 %v153_v10  ;;  %v239_v33 = vld [vmem:[#allocation7 + $0xa0] sm:$0xff]  ;;  %v238_v34 = vld [vmem:[#allocation7 + $0x98] sm:$0xff]  ;;  %v237_v40 = vld [vmem:[#allocation7 + $0x90] sm:$0xff] }
  0x31   :  { %464 = vmatprep.mubr.msk.f32.mxu0 %vm567_vm0, %v566_v0  ;;  %407 = vmatprep.subr.mxu1 %v566_v0  ;;  %v343_v35 = vld [vmem:[%s660_s3] ss:$0 sm:$0xff]  ;;  %v236_v41 = vld [vmem:[#allocation7 + $0x88] sm:$0xff]  ;;  %v235_v42 = vld [vmem:[#allocation7 + $0x80] sm:$0xff] }
  0x32   :  { %408 = vmatpush3.msra.mxu1 %v152_v11  ;;  %433 = vmatpush3.msra.mxu0 %v250_v22  ;;  %v345_v43 = vld [vmem:[%s660_s3 + $0x1] ss:$0 sm:$0xff]  ;;  %v346_v48 = vld [vmem:[%s660_s3 + $0x2] ss:$0 sm:$0xff] }
  0x33   :  { %409 = vmatprep.subr.mxu1 %v566_v0  ;;  %434 = vmatprep.subr.mxu0 %v566_v0 }
  0x34   :  { %410 = vmatpush3.msra.mxu1 %v151_v12  ;;  %435 = vmatpush3.msra.mxu0 %v249_v23 }
  0x35   :  { %411 = vmatprep.subr.mxu1 %v566_v0  ;;  %436 = vmatprep.subr.mxu0 %v566_v0 }
  0x36   :  { %412 = vmatpush3.msra.mxu1 %v150_v13  ;;  %437 = vmatpush3.msra.mxu0 %v248_v24 }
  0x37   :  { %413 = vmatprep.subr.mxu1 %v566_v0  ;;  %438 = vmatprep.subr.mxu0 %v566_v0 }
  0x38   :  { %414 = vmatpush3.msra.mxu1 %v149_v14  ;;  %439 = vmatpush3.msra.mxu0 %v247_v25 }
  0x39   :  { %415 = vmatprep.subr.mxu1 %v566_v0  ;;  %440 = vmatprep.subr.mxu0 %v566_v0 }
  0x3a   :  { %416 = vmatpush3.msra.mxu1 %v148_v15  ;;  %441 = vmatpush3.msra.mxu0 %v246_v26 }
  0x3b   :  { %417 = vmatprep.subr.mxu1 %v566_v0  ;;  %442 = vmatprep.subr.mxu0 %v566_v0 }
  0x3c   :  { %418 = vmatpush3.msra.mxu1 %v147_v16  ;;  %443 = vmatpush3.msra.mxu0 %v245_v27 }
  0x3d   :  { %419 = vmatprep.subr.mxu1 %v566_v0  ;;  %444 = vmatprep.subr.mxu0 %v566_v0 }
  0x3e   :  { %420 = vmatpush3.msra.mxu1 %v146_v17  ;;  %445 = vmatpush3.msra.mxu0 %v244_v28 }
  0x3f   :  { %421 = vmatprep.subr.mxu1 %v566_v0  ;;  %446 = vmatprep.subr.mxu0 %v566_v0 }
  0x40   :  { %422 = vmatpush3.msra.mxu1 %v145_v18  ;;  %447 = vmatpush3.msra.mxu0 %v243_v29 }
  0x41   :  { %423 = vmatprep.subr.mxu1 %v566_v0  ;;  %448 = vmatprep.subr.mxu0 %v566_v0 }
  0x42   :  { %424 = vmatpush3.msra.mxu1 %v144_v19  ;;  %449 = vmatpush3.msra.mxu0 %v242_v30 }
  0x43   :  { %425 = vmatprep.subr.mxu1 %v566_v0  ;;  %450 = vmatprep.subr.mxu0 %v566_v0 }
  0x44   :  { %426 = vmatpush3.msra.mxu1 %v143_v20  ;;  %451 = vmatpush3.msra.mxu0 %v241_v31 }
  0x45   :  { %427 = vmatprep.subr.mxu1 %v566_v0  ;;  %452 = vmatprep.subr.mxu0 %v566_v0 }
  0x46   :  { %428 = vmatpush3.msra.mxu1 %v142_v21  ;;  %453 = vmatpush3.msra.mxu0 %v240_v32 }
  0x47   :  { %454 = vmatprep.subr.mxu0 %v566_v0 }
  0x48   :  { %455 = vmatpush3.msra.mxu0 %v239_v33 }
  0x49   :  { %456 = vmatprep.subr.mxu0 %v566_v0 }
  0x4a   :  { %457 = vmatpush3.msra.mxu0 %v238_v34 }
  0x4b   :  { %458 = vmatprep.subr.mxu0 %v566_v0 }
  0x4c   :  { %459 = vmatpush3.msra.mxu0 %v237_v40 }
  0x4d   :  { %460 = vmatprep.subr.mxu0 %v566_v0 }
  0x4e   :  { %461 = vmatpush3.msra.mxu0 %v236_v41 }
  0x4f   :  { %462 = vmatprep.subr.mxu0 %v566_v0 }
  0x50   :  { %463 = vmatpush3.msra.mxu0 %v235_v42 }
  0xef   :  { %v137_v36 = vpop.f32.mrf.mxu0 }
  0xf0   :  { %v138_v37 = vadd.f32 %v343_v35, %v137_v36 }
  0xf1   :  { %v396_v38 = vpop.f32.mrf.mxu0 }
  0xf2   :  { %v141_v39 = vmax.f32 %v138_v37, 0.0 }
  0xf4   :  { %430 = vmatmul.mubr.f32.vlgmr.msra.gmra.mxu1 %v141_v39 }
 0x1b4   :  { %v229_v44 = vpop.f32.mrf.mxu1 }
 0x1b5   :  { %v230_v45 = vadd.f32 %v345_v43, %v229_v44 }
 0x1b6   :  { %v431_v46 = vpop.f32.mrf.mxu1 }
 0x1b7   :  { %v233_v47 = vmax.f32 %v230_v45, 0.0 }
 0x1b9   :  { %465 = vmatmul.mubr.f32.vlgmr.msra.gmra.mxu0 %v233_v47 }
 0x279   :  { %v322_v49 = vpop.f32.mrf.mxu0 }
 0x27a   :  { %v323_v50 = vadd.f32 %v346_v48, %v322_v49 }
 0x27b   :  { %v466_v51 = vpop.f32.mrf.mxu0 }
 0x27c   :  { %326 = vst [vmem:[#allocation8] sm:$0xff] %v323_v50 }
 0x27d   :  { %546 = shalt.err (!%p543_p5)
}
 0x27e   :  { %336 = dma.vmem_to_hbm [thread:$0]  %s334_s10, 128, %s661_s4, [#allocation4]  }
 0x27f   :  { %559 = dma.done.wait [#allocation4], 128  }
 0x280   :  { %560 = vsyncadd [#allocation4], 4294967168 }
 0x281   :  { %340 = vsyncpa [#allocation3], 1 }
 0x282   :  { %341 = vsyncpa [#allocation6], 1 }
 0x283   :  { %342 = vsyncpa [#allocation4], 1 }

</bundles_post_ra>
